<compile_context>
chip_gen: v6e
topology: v6e:2x2x1
jax: 0.10.0
libtpu: 0.0.40
codegen_flags: <defaults>
</compile_context>

<pallas_src>
import math

import jax
import jax.numpy as jnp
from jax.experimental import pallas as pl
from jax.experimental.pallas import tpu as pltpu

# ---- ArcFace hyperparameters (module __init__ defaults) ----
SCALE = 64.0
MARGIN = 0.5
EASY_MARGIN = False
COS_M = math.cos(MARGIN)
SIN_M = math.sin(MARGIN)
TH = math.cos(math.pi - MARGIN)
MM = math.sin(math.pi - MARGIN) * MARGIN


def _arcface_kernel(cos_ref, ids_ref, out_ref):
    # cos_ref: (tb, C) raw similarities; ids_ref: (tb, 1) int32 class ids;
    # out_ref: (1, 8, 128) per-tile partial-sum slab (lane-dense store).
    x = cos_ref[...].astype(jnp.float32)                        # (tb, C)
    ids = ids_ref[...]                                          # (tb, 1) int32

    # F.normalize(p=2, dim=1): x / max(||x||, 1e-12) == x * rsqrt(max(||x||^2, 1e-24))
    sumsq = jnp.sum(x * x, axis=-1, keepdims=True)              # (tb, 1)
    inv_norm = jax.lax.rsqrt(jnp.maximum(sumsq, 1e-24))
    cosine = x * inv_norm

    sine = jnp.sqrt(1.0 - cosine * cosine + 1e-7)
    phi = cosine * COS_M - sine * SIN_M
    if EASY_MARGIN:
        phi = jnp.where(cosine > 0.0, phi, cosine)
    else:
        phi = jnp.where(cosine > TH, phi, cosine - MM)

    # Rebuild the one-hot mask in-kernel (avoids streaming a (B, C) labels array).
    one_hot = jax.lax.broadcasted_iota(jnp.int32, cosine.shape, 1) == ids

    # output = scale * (one_hot * phi + (1 - one_hot) * cosine)
    logits = SCALE * jnp.where(one_hot, phi, cosine)

    # binary_cross_entropy_with_logits (stable form), target y == one_hot (0/1):
    #   bce = max(z, 0) - z*y + log1p(exp(-|z|))
    bce = (jnp.maximum(logits, 0.0)
           + jnp.log1p(jnp.exp(-jnp.abs(logits)))
           - jnp.where(one_hot, logits, 0.0))

    partial = jnp.sum(bce)                                      # one XLU reduce per tile
    # Broadcast the scalar across the lane-dense block (unmasked vector store);
    # the wrapper reads only [:, 0, 0].
    out_ref[...] = jnp.full(out_ref.shape, partial, dtype=out_ref.dtype)


def _choose_tb(B, C, itemsize, vmem_budget_bytes):
    """Largest row tile dividing B (multiple of 8, or B itself) whose
    double-buffered inputs fit inside the VMEM budget."""
    def fits(t):
        return 2 * t * (C * itemsize + 4) <= vmem_budget_bytes
    cands = [d for d in range(8, B + 1, 8) if B % d == 0]
    if B not in cands:
        cands.append(B)           # block == full array dim is always legal
    cands = sorted(set(cands))
    best = None
    for t in cands:
        if fits(t):
            best = t
    return best if best is not None else min(cands)


def arcface_loss(cosine, class_ids, *, tb=None, vmem_budget_bytes=12 << 20):
    """ArcFaceLoss forward. `cosine`: (B, C) float; `class_ids`: (B,) int labels."""
    B, C = cosine.shape
    itemsize = jnp.dtype(cosine.dtype).itemsize
    if tb is None:
        tb = _choose_tb(B, C, itemsize, vmem_budget_bytes)
    assert B % tb == 0, (B, tb)
    num_tiles = B // tb

    ids2d = class_ids.astype(jnp.int32).reshape(B, 1)

    partials = pl.pallas_call(
        _arcface_kernel,
        out_shape=jax.ShapeDtypeStruct((num_tiles, 8, 128), jnp.float32),
        grid_spec=pltpu.PrefetchScalarGridSpec(
            num_scalar_prefetch=0,
            grid=(num_tiles,),
            in_specs=[
                pl.BlockSpec((tb, C), lambda i: (i, 0)),   # cosine rows
                pl.BlockSpec((tb, 1), lambda i: (i, 0)),   # class ids (tiny)
            ],
            out_specs=pl.BlockSpec((1, 8, 128), lambda i: (i, 0, 0)),
        ),
        compiler_params=pltpu.CompilerParams(
            dimension_semantics=("parallel",),             # independent tiles -> megacore OK
            vmem_limit_bytes=32 << 20,                     # safe on v5e/v6e/v7x
        ),
    )(cosine, ids2d)

    total = float(B * C)
    return jnp.sum(partials[:, 0, 0]) * (1.0 / total)      # reduction='mean'


def arcface_loss_from_onehot(cosine, labels_onehot, **kw):
    """Matches the PyTorch forward signature (labels already one-hot)."""
    class_ids = jnp.argmax(labels_onehot, axis=1).astype(jnp.int32)
    return arcface_loss(cosine, class_ids, **kw)


def arcface_loss_ref(cosine, labels_onehot):
    # Pure-JAX mirror of the PyTorch module for correctness checking.
    x = cosine.astype(jnp.float32)
    y = labels_onehot.astype(jnp.float32)
    norm = jnp.sqrt(jnp.sum(x * x, axis=1, keepdims=True))
    c = x / jnp.maximum(norm, 1e-12)
    s = jnp.sqrt(1.0 - c * c + 1e-7)
    phi = c * COS_M - s * SIN_M
    if EASY_MARGIN:
        phi = jnp.where(c > 0.0, phi, c)
    else:
        phi = jnp.where(c > TH, phi, c - MM)
    logits = (y * phi + (1.0 - y) * c) * SCALE
    bce = jnp.maximum(logits, 0.0) - logits * y + jnp.log1p(jnp.exp(-jnp.abs(logits)))
    return jnp.mean(bce)


if __name__ == "__main__":
    B, C = 16, 128   # small shapes: batch=16, num_classes=128
    key = jax.random.PRNGKey(0)
    k1, k2 = jax.random.split(key)
    cosine = jax.random.normal(k1, (B, C), dtype=jnp.float32)
    class_ids = jax.random.randint(k2, (B,), 0, C)
    labels = jax.nn.one_hot(class_ids, C, dtype=jnp.float32)   # only for the reference

    loss = arcface_loss(cosine, class_ids)
    loss = jax.block_until_ready(loss)

    ref = arcface_loss_ref(cosine, labels)
    assert jnp.allclose(loss, ref, rtol=1e-5, atol=1e-4), (loss, ref)

    # Also check the one-hot-signature wrapper (module-equivalent interface).
    loss2 = jax.block_until_ready(arcface_loss_from_onehot(cosine, labels))
    assert jnp.allclose(loss2, ref, rtol=1e-5, atol=1e-4), (loss2, ref)

    print("KERNEL_OK")
</pallas_src>

<mosaic_0001>
module attributes {stable_mosaic.version = 11 : i64} {
  func.func @_arcface_kernel(%arg0: i32, %arg1: memref<16x128xf32, #tpu.memory_space<vmem>>, %arg2: memref<16x1xi32, #tpu.memory_space<vmem>>, %arg3: memref<1x8x128xf32, #tpu.memory_space<vmem>>) attributes {dimension_semantics = [#tpu.dimension_semantics<parallel>], iteration_bounds = array<i64: 1>, scalar_prefetch = 0 : i64, scratch_operands = 0 : i64, tpu.core_type = #tpu.core_type<tc>, window_params = [{transform_indices = @transform_0, window_bounds = array<i64: 16, 128>}, {transform_indices = @transform_1, window_bounds = array<i64: 16, 1>}, {transform_indices = @transform_2, window_bounds = array<i64: 1, 8, 128>}]} {
    %c0 = arith.constant 0 : index
    %c0_0 = arith.constant 0 : index
    %0 = vector.load %arg1[%c0, %c0_0] : memref<16x128xf32, #tpu.memory_space<vmem>>, vector<16x128xf32>
    %c0_1 = arith.constant 0 : index
    %c0_2 = arith.constant 0 : index
    %1 = vector.load %arg2[%c0_1, %c0_2] : memref<16x1xi32, #tpu.memory_space<vmem>>, vector<16x1xi32>
    %2 = arith.mulf %0, %0 : vector<16x128xf32>
    %cst = arith.constant dense<0.000000e+00> : vector<16xf32>
    %3 = vector.multi_reduction <add>, %2, %cst [1] : vector<16x128xf32> to vector<16xf32>
    %4 = vector.shape_cast %3 : vector<16xf32> to vector<16x1xf32>
    %cst_3 = arith.constant 1.000000e-24 : f32
    %5 = vector.broadcast %cst_3 : f32 to vector<16x1xf32>
    %6 = arith.maximumf %4, %5 : vector<16x1xf32>
    %7 = math.rsqrt %6 : vector<16x1xf32>
    %8 = vector.broadcast %7 : vector<16x1xf32> to vector<16x128xf32>
    %9 = arith.mulf %0, %8 : vector<16x128xf32>
    %10 = arith.mulf %9, %9 : vector<16x128xf32>
    %cst_4 = arith.constant 1.000000e+00 : f32
    %11 = vector.broadcast %cst_4 : f32 to vector<16x128xf32>
    %12 = arith.subf %11, %10 : vector<16x128xf32>
    %cst_5 = arith.constant 1.000000e-07 : f32
    %13 = vector.broadcast %cst_5 : f32 to vector<16x128xf32>
    %14 = arith.addf %12, %13 : vector<16x128xf32>
    %15 = math.sqrt %14 : vector<16x128xf32>
    %cst_6 = arith.constant 0.87758255 : f32
    %16 = vector.broadcast %cst_6 : f32 to vector<16x128xf32>
    %17 = arith.mulf %9, %16 : vector<16x128xf32>
    %cst_7 = arith.constant 0.47942555 : f32
    %18 = vector.broadcast %cst_7 : f32 to vector<16x128xf32>
    %19 = arith.mulf %15, %18 : vector<16x128xf32>
    %20 = arith.subf %17, %19 : vector<16x128xf32>
    %cst_8 = arith.constant -0.87758255 : f32
    %21 = vector.broadcast %cst_8 : f32 to vector<16x128xf32>
    %22 = arith.cmpf ogt, %9, %21 : vector<16x128xf32>
    %cst_9 = arith.constant 0.239712775 : f32
    %23 = vector.broadcast %cst_9 : f32 to vector<16x128xf32>
    %24 = arith.subf %9, %23 : vector<16x128xf32>
    %25 = arith.select %22, %20, %24 : vector<16x128xi1>, vector<16x128xf32>
    %26 = tpu.iota {dimensions = array<i32: 1>} : vector<16x128xi32>
    %27 = vector.broadcast %1 : vector<16x1xi32> to vector<16x128xi32>
    %28 = arith.cmpi eq, %26, %27 : vector<16x128xi32>
    %29 = arith.select %28, %25, %9 : vector<16x128xi1>, vector<16x128xf32>
    %cst_10 = arith.constant 6.400000e+01 : f32
    %30 = vector.broadcast %cst_10 : f32 to vector<16x128xf32>
    %31 = arith.mulf %30, %29 : vector<16x128xf32>
    %cst_11 = arith.constant 0.000000e+00 : f32
    %32 = vector.broadcast %cst_11 : f32 to vector<16x128xf32>
    %33 = arith.maximumf %31, %32 : vector<16x128xf32>
    %34 = math.absf %31 : vector<16x128xf32>
    %cst_12 = arith.constant 0.000000e+00 : f32
    %35 = vector.broadcast %cst_12 : f32 to vector<16x128xf32>
    %36 = arith.subf %35, %34 : vector<16x128xf32>
    %37 = math.exp %36 : vector<16x128xf32>
    %38 = math.log1p %37 : vector<16x128xf32>
    %39 = arith.addf %33, %38 : vector<16x128xf32>
    %cst_13 = arith.constant 0.000000e+00 : f32
    %40 = vector.broadcast %cst_13 : f32 to vector<16x128xf32>
    %41 = arith.select %28, %31, %40 : vector<16x128xi1>, vector<16x128xf32>
    %42 = arith.subf %39, %41 : vector<16x128xf32>
    %43 = vector.shape_cast %42 : vector<16x128xf32> to vector<1x16x128xf32>
    %cst_14 = arith.constant dense<0.000000e+00> : vector<1xf32>
    %44 = vector.multi_reduction <add>, %43, %cst_14 [1, 2] : vector<1x16x128xf32> to vector<1xf32>
    %45 = vector.shape_cast %44 : vector<1xf32> to vector<1x1x1xf32>
    %46 = vector.extract %45[0, 0, 0] : f32 from vector<1x1x1xf32>
    %47 = vector.broadcast %46 : f32 to vector<1x8x128xf32>
    %c0_15 = arith.constant 0 : index
    %c0_16 = arith.constant 0 : index
    %c0_17 = arith.constant 0 : index
    %48 = vector.load %arg3[%c0_15, %c0_16, %c0_17] : memref<1x8x128xf32, #tpu.memory_space<vmem>>, vector<1x8x128xf32>
    tpu.vector_store %arg3[%c0_15, %c0_16, %c0_17], %47 {strides = array<i32>} : memref<1x8x128xf32, #tpu.memory_space<vmem>>, vector<1x8x128xf32>,
    return
  }
  func.func @transform_0(%arg0: i32) -> (i32, i32) {
    %c0_i32 = arith.constant 0 : i32
    %c0_i32_0 = arith.constant 0 : i32
    return %arg0, %c0_i32 : i32, i32
  }
  func.func @transform_1(%arg0: i32) -> (i32, i32) {
    %c0_i32 = arith.constant 0 : i32
    %c0_i32_0 = arith.constant 0 : i32
    return %arg0, %c0_i32 : i32, i32
  }
  func.func @transform_2(%arg0: i32) -> (i32, i32, i32) {
    %c0_i32 = arith.constant 0 : i32
    %c0_i32_0 = arith.constant 0 : i32
    %c0_i32_1 = arith.constant 0 : i32
    return %arg0, %c0_i32, %c0_i32_0 : i32, i32, i32
  }
}

</mosaic_0001>

<bundles_post_ra>
// kernel: tpu_custom_call.1
= control target key start
LH: loop header
LB: loop body
LE: loop exit
PB: predicated region body
PF: predicated region fallthrough
CT: control target
= control target key end

     0   :  { %v180_v4 = vmov 0   ;;  %s224_s0 = inlined_call_operand.vmem [shape: f32[16,128], index: 0, kind: input, shape index: {}]   ;;  %s225_s1 = inlined_call_operand.vmem [shape: s32[16,1], index: 1, kind: input, shape index: {}]   ;;  %s226_s2 = inlined_call_operand.hbm [shape: f32[1,8,128], index: 2, kind: output, shape index: {}]  }
   0x1   :  { %v12_v0 = vld [vmem:[%s224_s0] sm:$0xff]  ;;  %v13_v1 = vld [vmem:[%s224_s0 + $0x8] sm:$0xff]  ;;  %140 = vset.pattern.permute.xlu1 %v180_v4  ;;  %141 = vset.pattern.permute.xlu0 %v180_v4 }
   0x2   :  { %v14_v2 = vld [vmem:[%s225_s1] sm:$0xff]  ;;  %v16_v3 = vmul.f32 %v12_v0, %v12_v0 }
   0x3   :  { %7 = vsyncpa [#allocation3], 0  ;;  %63 = vperm.xlu1 %140, %v14_v2   ;;  %v17_v5 = vmul.f32 %v13_v1, %v13_v1  ;;  %v15_v6 = vld [vmem:[%s225_s1 + $0x8] sm:$0xff]  ;;  %v60_v21 = vlaneseq  ;;  %s181_s0 = smov [#allocation2]  }
   0x4   :  { %18 = vadd.xlane.f32.xlu0 %v16_v3  ;;  %s126_s1 = sshll.u32 %s181_s0, 4  ;;  %s127_s1 = int_to_ptr.vmem [resolvable:$true] %s126_s1 }
   0x5   :  { %v209_v24 = vand.u32 127, %v60_v21  ;;  %s158_s18 = scalar_lea.vmem %s127_s1, 128  ;;  %p163_p1 = scmp.lt.s32.totalorder %s127_s1, %s127_s1 }
   0x6   :  { %p159_p0 = scmp.ne.s32.totalorder %s127_s1, %s158_s18  ;;  %p164_p2 = scmp.lt.s32.totalorder %s158_s18, %s158_s18 }
   0x7   :  { %66 = vperm.xlu1 %140, %v15_v6  }
   0x8   :  { %20 = vadd.xlane.f32.xlu0 %v17_v5  ;;  %p165_p3 = por %p164_p2, %p163_p1 }
   0xa   :  { %p166_p4 = pnand %p165_p3, %p159_p0 }
  0x7e   :  { %v64_v28 = vpop.permute.xlu1 %63 }
  0x7f   :  { %vm68_vm2 = vcmp.eq.s32.totalorder %v209_v24, %v64_v28 }
  0x82   :  { %v67_v42 = vpop.permute.xlu1 %66 }
  0x83   :  { %vm69_vm7 = vcmp.eq.s32.totalorder %v209_v24, %v67_v42 }
  0x8d   :  { %v19_v7 = vpop.xlane.xlu0 %18 }
  0x8e   :  { %v22_v8 = vmax.f32 %v19_v7, 1e-24 }
  0x90   :  { %142 = vrsqrt.f32 %v22_v8 }
  0x91   :  { %v21_v9 = vpop.xlane.xlu0 %20 }
  0x92   :  { %v23_v10 = vmax.f32 %v21_v9, 1e-24 }
  0x94   :  { %144 = vrsqrt.f32 %v23_v10 }
  0x9d   :  { %v143_v11 = vpop.eup %142 }
  0x9e   :  { %v26_v12 = vmul.f32 %v143_v11, %v12_v0 }
  0xa0   :  { %v28_v13 = vmul.f32 %v26_v12, %v26_v12  ;;  %v48_v30 = vmul.f32 0.87758255, %v26_v12  ;;  %v134_v35 = vadd.f32 -0.23971277, %v26_v12  ;;  %vm54_vm5 = vcmp.gt.f32.partialorder %v26_v12, -0.87758255 }
  0xa1   :  { %v145_v14 = vpop.eup %144 }
  0xa2   :  { %v30_v15 = vsub.f32 1.0, %v28_v13  ;;  %v27_v16 = vmul.f32 %v145_v14, %v13_v1 }
  0xa4   :  { %v32_v17 = vadd.f32 1e-07, %v30_v15  ;;  %v29_v18 = vmul.f32 %v27_v16, %v27_v16  ;;  %v49_v39 = vmul.f32 0.87758255, %v27_v16  ;;  %v135_v45 = vadd.f32 -0.23971277, %v27_v16 }
  0xa5   :  { %vm55_vm6 = vcmp.gt.f32.partialorder %v27_v16, -0.87758255 }
  0xa6   :  { %v31_v19 = vsub.f32 1.0, %v29_v18  ;;  %146 = vrsqrt.f32 %v32_v17  ;;  %vm36_vm0 = vcmp.eq.f32.partialorder %v32_v17, inf  ;;  %v39_v25 = vand.u32 2147483648, %v32_v17 }
  0xa7   :  { %vm38_vm1 = vcmp.eq.f32.partialorder %v32_v17, 0.0 }
  0xa8   :  { %v33_v20 = vadd.f32 1e-07, %v31_v19 }
  0xaa   :  { %148 = vrsqrt.f32 %v33_v20  ;;  %vm43_vm3 = vcmp.eq.f32.partialorder %v33_v20, inf  ;;  %v46_v33 = vand.u32 2147483648, %v33_v20  ;;  %vm45_vm4 = vcmp.eq.f32.partialorder %v33_v20, 0.0 }
  0xb3   :  { %v147_v22 = vpop.eup %146 }
  0xb4   :  { %v35_v23 = vmul.f32 %v147_v22, %v32_v17 }
  0xb6   :  { %v37_v26 = vsel %vm36_vm0, %v32_v17, %v35_v23 }
  0xb7   :  { %v149_v27 = vpop.eup %148  ;;  %v40_v29 = vsel %vm38_vm1, %v39_v25, %v37_v26 }
  0xb8   :  { %v50_v31 = vmul.f32 0.47942555, %v40_v29  ;;  %v42_v32 = vmul.f32 %v149_v27, %v33_v20 }
  0xba   :  { %v52_v34 = vsub.f32 %v48_v30, %v50_v31  ;;  %v44_v36 = vsel %vm43_vm3, %v33_v20, %v42_v32 }
  0xbb   :  { %v47_v37 = vsel %vm45_vm4, %v46_v33, %v44_v36 }
  0xbc   :  { %v58_v38 = vsel %vm54_vm5, %v52_v34, %v134_v35  ;;  %v51_v40 = vmul.f32 0.47942555, %v47_v37 }
  0xbd   :  { %v70_v41 = vsel %vm68_vm2, %v58_v38, %v26_v12 }
  0xbe   :  { %v72_v43 = vmul.f32 64.0, %v70_v41  ;;  %v53_v44 = vsub.f32 %v49_v39, %v51_v40 }
  0xc0   :  { %v76_v46 = vand.u32 2147483647, %v72_v43  ;;  %v59_v47 = vsel %vm55_vm6, %v53_v44, %v135_v45  ;;  %v74_v6 = vmax.f32 %v72_v43, 0.0  ;;  %v104_v13 = vsel %vm68_vm2, %v72_v43, 0.0 }
  0xc1   :  { %v71_v48 = vsel %vm69_vm7, %v59_v47, %v27_v16 }
  0xc2   :  { %v78_v49 = vsub.f32 0.0, %v76_v46  ;;  %v73_v50 = vmul.f32 64.0, %v71_v48 }
  0xc4   :  { %v80_v51 = vmul.f32 1.442695, %v78_v49  ;;  %v77_v52 = vand.u32 2147483647, %v73_v50  ;;  %v75_v10 = vmax.f32 %v73_v50, 0.0  ;;  %v105_v14 = vsel %vm69_vm7, %v73_v50, 0.0 }
  0xc6   :  { %150 = vpow2.f32 %v80_v51  ;;  %v79_v53 = vsub.f32 0.0, %v77_v52 }
  0xc8   :  { %v82_v54 = vmul.f32 1.442695, %v79_v53 }
  0xca   :  { %152 = vpow2.f32 %v82_v54 }
  0xd3   :  { %v151_v55 = vpop.eup %150 }
  0xd4   :  { %v84_v56 = vadd.f32 1.0, %v151_v55  ;;  %v87_v59 = vmul.f32 -0.5, %v151_v55  ;;  %v90_v62 = vand.u32 2147483647, %v151_v55 }
  0xd6   :  { %154 = vlog2.f32 %v84_v56  ;;  %v88_v60 = vadd.f32 1.0, %v87_v59  ;;  %vm91_vm8 = vcmp.lt.f32.partialorder %v90_v62, 0.0004427343 }
  0xd7   :  { %v153_v57 = vpop.eup %152 }
  0xd8   :  { %v93_v58 = vadd.f32 1.0, %v153_v57  ;;  %v96_v61 = vmul.f32 -0.5, %v153_v57  ;;  %v89_v1 = vmul.f32 %v151_v55, %v88_v60  ;;  %v99_v3 = vand.u32 2147483647, %v153_v57 }
  0xda   :  { %156 = vlog2.f32 %v93_v58  ;;  %v97_v2 = vadd.f32 1.0, %v96_v61  ;;  %vm100_vm9 = vcmp.lt.f32.partialorder %v99_v3, 0.0004427343 }
  0xdc   :  { %v98_v8 = vmul.f32 %v153_v57, %v97_v2 }
  0xe3   :  { %v155_v63 = vpop.eup %154 }
  0xe4   :  { %v86_v0 = vmul.f32 0.6931472, %v155_v63 }
  0xe6   :  { %v92_v4 = vsel %vm91_vm8, %v89_v1, %v86_v0 }
  0xe7   :  { %v157_v5 = vpop.eup %156  ;;  %v102_v9 = vadd.f32 %v92_v4, %v74_v6 }
  0xe8   :  { %v95_v7 = vmul.f32 0.6931472, %v157_v5 }
  0xe9   :  { %v106_v15 = vsub.f32 %v102_v9, %v104_v13 }
  0xea   :  { %v101_v11 = vsel %vm100_vm9, %v98_v8, %v95_v7 }
  0xeb   :  { %v103_v12 = vadd.f32 %v101_v11, %v75_v10 }
  0xed   :  { %v107_v16 = vsub.f32 %v103_v12, %v105_v14 }
  0xef   :  { %v108_v17 = vadd.f32 %v107_v16, %v106_v15 }
  0xf1   :  { %109 = vadd.xlane.f32.xlu0 %v108_v17 }
 0x17a   :  { %v110_v18 = vpop.xlane.xlu0 %109 }
 0x17b   :  { %v111_v19 = vrot.slane %v110_v18, 4 }
 0x17d   :  { %v112_v20 = vadd.f32 %v111_v19, %v110_v18 }
 0x17f   :  { %v113_v21 = vrot.slane %v112_v20, 2 }
 0x181   :  { %v114_v22 = vadd.f32 %v113_v21, %v112_v20 }
 0x183   :  { %v115_v23 = vrot.slane %v114_v22, 1 }
 0x185   :  { %v116_v25 = vadd.f32 %v115_v23, %v114_v22 }
 0x187   :  { %136 = vpush %v116_v25 }
 0x1b8   :  { %s137_s17 = spop %136 }
 0x1b9   :  { %v118_v26 = vstv %s137_s17 }
 0x1ba   :  { %119 = vst [vmem:[#allocation2] sm:$0xff] %v118_v26 }
 0x1bb   :  { %169 = shalt.err (!%p166_p4)
}
 0x1bc   :  { %129 = dma.vmem_to_hbm [thread:$0]  %s127_s1, 128, %s226_s2, [#allocation3]  }
 0x1bd   :  { %178 = dma.done.wait [#allocation3], 128  }
 0x1be   :  { %179 = vsyncadd [#allocation3], 4294967168 }
 0x1bf   :  { %133 = vsyncpa [#allocation3], 1 }

</bundles_post_ra>
